<compile_context>
chip_gen: v7x
topology: tpu7x:2x2x1
jax: 0.10.0
libtpu: 0.0.40
codegen_flags: <defaults>
</compile_context>

<pallas_src>
import functools

import jax
import jax.numpy as jnp
import numpy as np
from jax.experimental import pallas as pl
from jax.experimental.pallas import tpu as pltpu

_SUBLANE = 8
_VMEM_BUDGET = 24 * 1024 * 1024       # conservative working-set target (fits v7x)
_VMEM_LIMIT = 32 * 1024 * 1024        # raise v5e's 16 MiB default, safe on v6e/v7x
_FUSED_WEIGHT_LIMIT = 2 * 1024 * 1024  # use fused-GEMM path when kron weights fit here
_MAX_TILE = 2048


def _round_up(x: int, m: int) -> int:
    return ((x + m - 1) // m) * m


@functools.lru_cache(maxsize=64)
def _bilinear_weight_matrix_np(in_size: int, out_size: int) -> np.ndarray:
    """(out_size, in_size) dense weights reproducing PyTorch bilinear
    interpolation with align_corners=False (half-pixel centers)."""
    scale = in_size / out_size
    dst = np.arange(out_size, dtype=np.float64)
    src = (dst + 0.5) * scale - 0.5
    src = np.maximum(src, 0.0)                       # PyTorch clamps negative coords
    i0 = np.minimum(np.floor(src).astype(np.int64), in_size - 1)
    i1 = np.minimum(i0 + 1, in_size - 1)
    frac = src - i0
    w = np.zeros((out_size, in_size), dtype=np.float64)
    rows = np.arange(out_size)
    np.add.at(w, (rows, i0), 1.0 - frac)
    np.add.at(w, (rows, i1), frac)                   # if clamped, weights still sum to 1
    return w.astype(np.float32)


@functools.lru_cache(maxsize=64)
def _fused_weight_matrix_np(h_in: int, w_in: int, h_out: int, w_out: int) -> np.ndarray:
    """(H_in*W_in, H_out*W_out) matrix M with
       M[ih*W_in+iw, oh*W_out+ow] = wh[oh, ih] * ww[ow, iw]."""
    wh = _bilinear_weight_matrix_np(h_in, h_out)     # (H_out, H_in)
    ww = _bilinear_weight_matrix_np(w_in, w_out)     # (W_out, W_in)
    return np.kron(wh.T, ww.T).astype(np.float32)


def _choose_tiling(nc: int, bytes_per_image: int, reserved_bytes: int, align: int):
    """Pick (tile, grid, padded_nc) for the flattened N*C axis.

    Uses the largest tile that fits the VMEM budget (double-buffered in/out
    tiles + weights + f32 temps) and keeps >=2 grid steps for big problems so
    the 'parallel' axis can be sharded across v7x's two TensorCores."""
    avail = max(_VMEM_BUDGET - reserved_bytes, bytes_per_image)
    tile = max(1, int(avail // max(bytes_per_image, 1)))
    tile = min(tile, _MAX_TILE, max(nc, 1))
    if nc <= tile and nc >= 128:
        tile = pl.cdiv(nc, 2)                        # >=2 parallel steps (v7x megacore)
    grid_n = pl.cdiv(nc, tile)
    tile = _round_up(pl.cdiv(nc, grid_n), align)     # balance steps, keep alignment
    return tile, grid_n, tile * grid_n


# ---------------------------------------------------------------------------
# Kernels
# ---------------------------------------------------------------------------

def _fused_interp_kernel(m_ref, x_ref, o_ref):
    # m_ref: (H_in*W_in, H_out*W_out) fused bilinear weights
    # x_ref: (T, H_in*W_in)   tile of flattened images (lane-dense)
    # o_ref: (T, H_out*W_out) lane-dense output
    o_ref[...] = jnp.dot(
        x_ref[...], m_ref[...], preferred_element_type=jnp.float32
    ).astype(o_ref.dtype)


def _separable_interp_kernel(wh_ref, wwt_ref, x_ref, o_ref):
    # wh_ref : (H_out, H_in)   row-resize weights
    # wwt_ref: (W_in,  W_out)  col-resize weights (transposed)
    # x_ref  : (T, H_in, W_in)
    # o_ref  : (T, H_out, W_out)
    x = x_ref[...]
    tmp = jnp.einsum('oh,thw->tow', wh_ref[...], x,
                     preferred_element_type=jnp.float32)
    out = jnp.einsum('tow,wq->toq', tmp, wwt_ref[...],
                     preferred_element_type=jnp.float32)
    o_ref[...] = out.astype(o_ref.dtype)


# ---------------------------------------------------------------------------
# pallas_call wrappers
# ---------------------------------------------------------------------------

def _fused_interp(x2d, h_in, w_in, h_out, w_out, out_dtype):
    nc, k_in = x2d.shape
    k_out = h_out * w_out
    cd = x2d.dtype
    itemsize = jnp.dtype(cd).itemsize
    out_itemsize = jnp.dtype(out_dtype).itemsize

    m = jnp.asarray(_fused_weight_matrix_np(h_in, w_in, h_out, w_out), dtype=cd)
    w_bytes = k_in * k_out * itemsize

    # double-buffered input + output tiles, plus the f32 matmul result.
    per_img = 2 * k_in * itemsize + 2 * k_out * out_itemsize + k_out * 4
    tile, grid_n, nc_pad = _choose_tiling(nc, per_img, 2 * w_bytes, _SUBLANE)
    if nc_pad != nc:
        x2d = jnp.pad(x2d, ((0, nc_pad - nc), (0, 0)))

    cost = pl.CostEstimate(
        flops=2 * nc_pad * k_in * k_out,
        transcendentals=0,
        bytes_accessed=nc_pad * k_in * itemsize + nc_pad * k_out * out_itemsize + w_bytes,
    )

    out = pl.pallas_call(
        _fused_interp_kernel,
        out_shape=jax.ShapeDtypeStruct((nc_pad, k_out), out_dtype),
        grid_spec=pltpu.PrefetchScalarGridSpec(
            num_scalar_prefetch=0,
            grid=(grid_n,),
            in_specs=[
                pl.BlockSpec((k_in, k_out), lambda i: (0, 0)),
                pl.BlockSpec((tile, k_in), lambda i: (i, 0)),
            ],
            out_specs=pl.BlockSpec((tile, k_out), lambda i: (i, 0)),
        ),
        compiler_params=pltpu.CompilerParams(
            dimension_semantics=("parallel",),
            vmem_limit_bytes=_VMEM_LIMIT),
        cost_estimate=cost,
    )(m, x2d)
    return out[:nc] if nc_pad != nc else out


def _separable_interp(x3d, h_in, w_in, h_out, w_out, out_dtype):
    nc = x3d.shape[0]
    cd = x3d.dtype
    itemsize = jnp.dtype(cd).itemsize
    out_itemsize = jnp.dtype(out_dtype).itemsize

    wh = jnp.asarray(_bilinear_weight_matrix_np(h_in, h_out), dtype=cd)      # (H_out, H_in)
    wwt = jnp.asarray(_bilinear_weight_matrix_np(w_in, w_out).T, dtype=cd)   # (W_in, W_out)
    w_bytes = (h_out * h_in + w_in * w_out) * itemsize

    per_img = (2 * h_in * w_in * itemsize          # double-buffered input tile
               + 2 * h_out * w_out * out_itemsize  # double-buffered output tile
               + 2 * h_out * w_in * 4              # f32 intermediate (+ relayout slack)
               + h_out * w_out * 4)                # f32 result before cast
    tile, grid_n, nc_pad = _choose_tiling(nc, per_img, 2 * w_bytes, 1)
    if nc_pad != nc:
        x3d = jnp.pad(x3d, ((0, nc_pad - nc), (0, 0), (0, 0)))

    cost = pl.CostEstimate(
        flops=2 * nc_pad * (h_out * h_in * w_in + h_out * w_in * w_out),
        transcendentals=0,
        bytes_accessed=(nc_pad * h_in * w_in * itemsize
                        + nc_pad * h_out * w_out * out_itemsize + w_bytes),
    )

    out = pl.pallas_call(
        _separable_interp_kernel,
        out_shape=jax.ShapeDtypeStruct((nc_pad, h_out, w_out), out_dtype),
        grid_spec=pltpu.PrefetchScalarGridSpec(
            num_scalar_prefetch=0,
            grid=(grid_n,),
            in_specs=[
                pl.BlockSpec((h_out, h_in), lambda i: (0, 0)),
                pl.BlockSpec((w_in, w_out), lambda i: (0, 0)),
                pl.BlockSpec((tile, h_in, w_in), lambda i: (i, 0, 0)),
            ],
            out_specs=pl.BlockSpec((tile, h_out, w_out), lambda i: (i, 0, 0)),
        ),
        compiler_params=pltpu.CompilerParams(
            dimension_semantics=("parallel",),
            vmem_limit_bytes=_VMEM_LIMIT),
        cost_estimate=cost,
    )(wh, wwt, x3d)
    return out[:nc] if nc_pad != nc else out


class Interpolate:
    """JAX/Pallas port of the PyTorch Interpolate module (bilinear, align_corners=False)."""

    def __init__(self, size, mode='bilinear'):
        assert mode == 'bilinear', "only bilinear mode is implemented"
        # TODO(synk): antialias=True downsampling (non-default in PyTorch) is not implemented.
        self.size = (int(size[0]), int(size[1]))
        self.mode = mode

    def __call__(self, x: jnp.ndarray) -> jnp.ndarray:
        N, C, H_in, W_in = x.shape
        H_out, W_out = self.size
        out_dtype = x.dtype

        # Keep bf16 on the MXU (v6e/v7x bf16-native); everything else computes in f32.
        cd = jnp.bfloat16 if x.dtype == jnp.bfloat16 else jnp.float32
        if x.dtype != cd:
            x = x.astype(cd)

        nc = N * C
        if H_in * W_in * H_out * W_out * 4 <= _FUSED_WEIGHT_LIMIT:
            out = _fused_interp(x.reshape(nc, H_in * W_in),
                                H_in, W_in, H_out, W_out, out_dtype)
        else:
            out = _separable_interp(x.reshape(nc, H_in, W_in),
                                    H_in, W_in, H_out, W_out, out_dtype)
        return out.reshape(N, C, H_out, W_out)


def _reference(x, size):
    """Pure-JAX reference using the same separable-weight formulation."""
    _, _, H_in, W_in = x.shape
    H_out, W_out = size
    wh = jnp.asarray(_bilinear_weight_matrix_np(H_in, H_out))
    ww = jnp.asarray(_bilinear_weight_matrix_np(W_in, W_out))
    return jnp.einsum('oh,nchw,qw->ncoq', wh, x.astype(jnp.float32), ww).astype(x.dtype)


if __name__ == "__main__":
    key = jax.random.PRNGKey(0)
    x = jax.random.normal(key, (2, 4, 16, 16), dtype=jnp.float32)

    # Upsample (fused single-GEMM path).
    out = jax.block_until_ready(Interpolate(size=(24, 24), mode='bilinear')(x))
    np.testing.assert_allclose(np.asarray(out), np.asarray(_reference(x, (24, 24))),
                               rtol=1e-5, atol=1e-5)
    assert out.shape == (2, 4, 24, 24)

    # Asymmetric downsample (fused path).
    out2 = jax.block_until_ready(Interpolate(size=(8, 12), mode='bilinear')(x))
    np.testing.assert_allclose(np.asarray(out2), np.asarray(_reference(x, (8, 12))),
                               rtol=1e-5, atol=1e-5)
    assert out2.shape == (2, 4, 8, 12)

    # Larger spatial size exercises the separable (two-matmul) fallback path.
    xb = jax.random.normal(jax.random.PRNGKey(1), (1, 2, 40, 48), dtype=jnp.float32)
    out3 = jax.block_until_ready(Interpolate(size=(72, 80), mode='bilinear')(xb))
    np.testing.assert_allclose(np.asarray(out3), np.asarray(_reference(xb, (72, 80))),
                               rtol=1e-5, atol=1e-5)
    assert out3.shape == (1, 2, 72, 80)

    # bf16 smoke test (bf16 fed straight to the MXU, f32 accumulation).
    out_bf16 = jax.block_until_ready(Interpolate(size=(24, 24))(x.astype(jnp.bfloat16)))
    assert out_bf16.shape == (2, 4, 24, 24) and out_bf16.dtype == jnp.bfloat16

    print("KERNEL_OK")
</pallas_src>

<mosaic_0001>
module attributes {stable_mosaic.version = 11 : i64} {
  func.func @_fused_interp_kernel(%arg0: i32, %arg1: memref<256x576xf32, #tpu.memory_space<vmem>>, %arg2: memref<8x256xf32, #tpu.memory_space<vmem>>, %arg3: memref<8x576xf32, #tpu.memory_space<vmem>>) attributes {dimension_semantics = [#tpu.dimension_semantics<parallel>], iteration_bounds = array<i64: 1>, scalar_prefetch = 0 : i64, scratch_operands = 0 : i64, tpu.core_type = #tpu.core_type<tc>, window_params = [{pipeline_mode = #tpu.pipeline_mode<synchronous>, transform_indices = @transform_0, window_bounds = array<i64: 256, 576>}, {transform_indices = @transform_1, window_bounds = array<i64: 8, 256>}, {transform_indices = @transform_2, window_bounds = array<i64: 8, 576>}]} {
    %c0 = arith.constant 0 : index
    %c0_0 = arith.constant 0 : index
    %0 = vector.load %arg2[%c0, %c0_0] : memref<8x256xf32, #tpu.memory_space<vmem>>, vector<8x256xf32>
    %c0_1 = arith.constant 0 : index
    %c0_2 = arith.constant 0 : index
    %1 = vector.load %arg1[%c0_1, %c0_2] : memref<256x576xf32, #tpu.memory_space<vmem>>, vector<256x576xf32>
    %cst = arith.constant dense<0.000000e+00> : vector<8x576xf32>
    %2 = tpu.matmul %0, %1, %cst {dimension_numbers = #tpu.dot_dimension_numbers<[1], [0], [0], [1], [0, 0, 1, 1], [], []>} : vector<8x256xf32>, vector<256x576xf32>, vector<8x576xf32> -> vector<8x576xf32>
    %c0_3 = arith.constant 0 : index
    %c0_4 = arith.constant 0 : index
    %3 = vector.load %arg3[%c0_3, %c0_4] : memref<8x576xf32, #tpu.memory_space<vmem>>, vector<8x576xf32>
    tpu.vector_store %arg3[%c0_3, %c0_4], %2 {strides = array<i32>} : memref<8x576xf32, #tpu.memory_space<vmem>>, vector<8x576xf32>,
    return
  }
  func.func @transform_0(%arg0: i32) -> (i32, i32) {
    %c0_i32 = arith.constant 0 : i32
    %c0_i32_0 = arith.constant 0 : i32
    %c0_i32_1 = arith.constant 0 : i32
    return %c0_i32, %c0_i32_0 : i32, i32
  }
  func.func @transform_1(%arg0: i32) -> (i32, i32) {
    %c0_i32 = arith.constant 0 : i32
    %c0_i32_0 = arith.constant 0 : i32
    return %arg0, %c0_i32 : i32, i32
  }
  func.func @transform_2(%arg0: i32) -> (i32, i32) {
    %c0_i32 = arith.constant 0 : i32
    %c0_i32_0 = arith.constant 0 : i32
    return %arg0, %c0_i32 : i32, i32
  }
}

</mosaic_0001>

<bundles_post_ra>
// kernel: tpu_custom_call.1
= control target key start
LH: loop header
LB: loop body
LE: loop exit
PB: predicated region body
PF: predicated region fallthrough
CT: control target
= control target key end

     0   :  { %s1150_s0 = inlined_call_operand.vmem [shape: f32[256,576], index: 0, kind: input, shape index: {}]   ;;  %s1151_s1 = inlined_call_operand.vmem [shape: f32[8,256], index: 1, kind: input, shape index: {}]   ;;  %s1152_s2 = inlined_call_operand.hbm [shape: f32[8,576], index: 2, kind: output, shape index: {}]  }
   0x1   :  { %v15_v0 = vld [vmem:[%s1150_s0 + $0x8] sm:$0xff]  ;;  %v20_v1 = vld [vmem:[%s1150_s0 + $0x30] sm:$0xff]  ;;  %v14_v2 = vld [vmem:[%s1150_s0] sm:$0xff] }
   0x2   :  { %v441_v3 = vpack.c.bf16 %v20_v1, %v15_v0  ;;  %v19_v4 = vld [vmem:[%s1150_s0 + $0x28] sm:$0xff]  ;;  %v25_v5 = vld [vmem:[%s1150_s0 + $0x58] sm:$0xff]  ;;  %v30_v6 = vld [vmem:[%s1150_s0 + $0x80] sm:$0xff] }
   0x3   :  { %v443_v7 = vpack.c.bf16 %v19_v4, %v14_v2  ;;  %v445_v8 = vpack.c.bf16 %v30_v6, %v25_v5  ;;  %v24_v9 = vld [vmem:[%s1150_s0 + $0x50] sm:$0xff]  ;;  %v29_v10 = vld [vmem:[%s1150_s0 + $0x78] sm:$0xff]  ;;  %v35_v11 = vld [vmem:[%s1150_s0 + $0xa8] sm:$0xff] }
   0x4   :  { %442 = vmatprep.subr.bf16.mxu0 %v441_v3  ;;  %v40_v12 = vld [vmem:[%s1150_s0 + $0xd0] sm:$0xff]  ;;  %v447_v13 = vpack.c.bf16 %v29_v10, %v24_v9  ;;  %v34_v15 = vld [vmem:[%s1150_s0 + $0xa0] sm:$0xff]  ;;  %v39_v16 = vld [vmem:[%s1150_s0 + $0xc8] sm:$0xff] }
   0x5   :  { %444 = vmatpush1.bf16.msra.mxu0 %v443_v7  ;;  %v449_v14 = vpack.c.bf16 %v40_v12, %v35_v11  ;;  %v45_v17 = vld [vmem:[%s1150_s0 + $0xf8] sm:$0xff]  ;;  %v50_v18 = vld [vmem:[%s1150_s0 + $0x120] sm:$0xff]  ;;  %v451_v19 = vpack.c.bf16 %v39_v16, %v34_v15  ;;  %v44_v21 = vld [vmem:[%s1150_s0 + $0xf0] sm:$0xff] }
   0x6   :  { %446 = vmatprep.subr.bf16.mxu0 %v445_v8  ;;  %v453_v20 = vpack.c.bf16 %v50_v18, %v45_v17  ;;  %v49_v22 = vld [vmem:[%s1150_s0 + $0x118] sm:$0xff]  ;;  %v55_v23 = vld [vmem:[%s1150_s0 + $0x148] sm:$0xff]  ;;  %v60_v24 = vld [vmem:[%s1150_s0 + $0x170] sm:$0xff] }
   0x7   :  { %v455_v25 = vpack.c.bf16 %v49_v22, %v44_v21  ;;  %v17_v26 = vld [vmem:[%s1150_s0 + $0x18] sm:$0xff]  ;;  %v22_v27 = vld [vmem:[%s1150_s0 + $0x40] sm:$0xff]  ;;  %v16_v28 = vld [vmem:[%s1150_s0 + $0x10] sm:$0xff]  ;;  %v457_v29 = vpack.c.bf16 %v60_v24, %v55_v23 }
   0x8   :  { %v54_v30 = vld [vmem:[%s1150_s0 + $0x140] sm:$0xff]  ;;  %v59_v31 = vld [vmem:[%s1150_s0 + $0x168] sm:$0xff]  ;;  %v505_v32 = vpack.c.bf16 %v22_v27, %v17_v26  ;;  %v21_v33 = vld [vmem:[%s1150_s0 + $0x38] sm:$0xff] }
   0x9   :  { %448 = vmatpush1.bf16.msra.mxu0 %v447_v13  ;;  %v65_v34 = vld [vmem:[%s1150_s0 + $0x198] sm:$0xff]  ;;  %v70_v35 = vld [vmem:[%s1150_s0 + $0x1c0] sm:$0xff]  ;;  %v507_v36 = vpack.c.bf16 %v21_v33, %v16_v28  ;;  %v27_v37 = vld [vmem:[%s1150_s0 + $0x68] sm:$0xff]  ;;  %v459_v41 = vpack.c.bf16 %v59_v31, %v54_v30 }
   0xa   :  { %450 = vmatprep.subr.bf16.mxu0 %v449_v14  ;;  %506 = vmatprep.subr.bf16.mxu1 %v505_v32  ;;  %v32_v38 = vld [vmem:[%s1150_s0 + $0x90] sm:$0xff]  ;;  %v26_v39 = vld [vmem:[%s1150_s0 + $0x60] sm:$0xff]  ;;  %v31_v40 = vld [vmem:[%s1150_s0 + $0x88] sm:$0xff]  ;;  %v461_v46 = vpack.c.bf16 %v70_v35, %v65_v34 }
   0xb   :  { %v64_v42 = vld [vmem:[%s1150_s0 + $0x190] sm:$0xff]  ;;  %v69_v43 = vld [vmem:[%s1150_s0 + $0x1b8] sm:$0xff]  ;;  %508 = vmatpush1.bf16.msra.mxu1 %v507_v36  ;;  %v509_v44 = vpack.c.bf16 %v32_v38, %v27_v37  ;;  %v511_v45 = vpack.c.bf16 %v31_v40, %v26_v39  ;;  %v75_v47 = vld [vmem:[%s1150_s0 + $0x1e8] sm:$0xff] }
   0xc   :  { %v37_v48 = vld [vmem:[%s1150_s0 + $0xb8] sm:$0xff]  ;;  %v42_v49 = vld [vmem:[%s1150_s0 + $0xe0] sm:$0xff]  ;;  %v80_v50 = vld [vmem:[%s1150_s0 + $0x210] sm:$0xff]  ;;  %v463_v54 = vpack.c.bf16 %v69_v43, %v64_v42 }
   0xd   :  { %452 = vmatpush1.bf16.msra.mxu0 %v451_v19  ;;  %510 = vmatprep.subr.bf16.mxu1 %v509_v44  ;;  %v513_v51 = vpack.c.bf16 %v42_v49, %v37_v48  ;;  %v36_v52 = vld [vmem:[%s1150_s0 + $0xb0] sm:$0xff]  ;;  %v41_v53 = vld [vmem:[%s1150_s0 + $0xd8] sm:$0xff]  ;;  %v74_v55 = vld [vmem:[%s1150_s0 + $0x1e0] sm:$0xff]  ;;  %v465_v59 = vpack.c.bf16 %v80_v50, %v75_v47 }
   0xe   :  { %454 = vmatprep.subr.bf16.mxu0 %v453_v20  ;;  %v515_v56 = vpack.c.bf16 %v41_v53, %v36_v52  ;;  %v47_v57 = vld [vmem:[%s1150_s0 + $0x108] sm:$0xff]  ;;  %v52_v58 = vld [vmem:[%s1150_s0 + $0x130] sm:$0xff]  ;;  %v46_v62 = vld [vmem:[%s1150_s0 + $0x100] sm:$0xff] }
   0xf   :  { %512 = vmatpush1.bf16.msra.mxu1 %v511_v45  ;;  %v79_v60 = vld [vmem:[%s1150_s0 + $0x208] sm:$0xff]  ;;  %v517_v61 = vpack.c.bf16 %v52_v58, %v47_v57  ;;  %v85_v0 = vld [vmem:[%s1150_s0 + $0x238] sm:$0xff]  ;;  %v90_v1 = vld [vmem:[%s1150_s0 + $0x260] sm:$0xff] }
  0x10   :  { %514 = vmatprep.subr.bf16.mxu1 %v513_v51  ;;  %v51_v63 = vld [vmem:[%s1150_s0 + $0x128] sm:$0xff]  ;;  %v57_v2 = vld [vmem:[%s1150_s0 + $0x158] sm:$0xff]  ;;  %v62_v3 = vld [vmem:[%s1150_s0 + $0x180] sm:$0xff]  ;;  %v467_v4 = vpack.c.bf16 %v79_v60, %v74_v55  ;;  %v469_v8 = vpack.c.bf16 %v90_v1, %v85_v0 }
  0x11   :  { %456 = vmatpush1.bf16.msra.mxu0 %v455_v25  ;;  %v84_v5 = vld [vmem:[%s1150_s0 + $0x230] sm:$0xff]  ;;  %v89_v6 = vld [vmem:[%s1150_s0 + $0x258] sm:$0xff]  ;;  %v519_v7 = vpack.c.bf16 %v51_v63, %v46_v62  ;;  %v95_v9 = vld [vmem:[%s1150_s0 + $0x288] sm:$0xff]  ;;  %v521_v10 = vpack.c.bf16 %v62_v3, %v57_v2 }
  0x12   :  { %458 = vmatprep.subr.bf16.mxu0 %v457_v29  ;;  %v56_v11 = vld [vmem:[%s1150_s0 + $0x150] sm:$0xff]  ;;  %v61_v12 = vld [vmem:[%s1150_s0 + $0x178] sm:$0xff]  ;;  %v67_v14 = vld [vmem:[%s1150_s0 + $0x1a8] sm:$0xff]  ;;  %v471_v16 = vpack.c.bf16 %v89_v6, %v84_v5 }
  0x13   :  { %516 = vmatpush1.bf16.msra.mxu1 %v515_v56  ;;  %v100_v13 = vld [vmem:[%s1150_s0 + $0x2b0] sm:$0xff]  ;;  %v94_v17 = vld [vmem:[%s1150_s0 + $0x280] sm:$0xff]  ;;  %v99_v18 = vld [vmem:[%s1150_s0 + $0x2a8] sm:$0xff]  ;;  %v523_v19 = vpack.c.bf16 %v61_v12, %v56_v11 }
  0x14   :  { %518 = vmatprep.subr.bf16.mxu1 %v517_v61  ;;  %v72_v15 = vld [vmem:[%s1150_s0 + $0x1d0] sm:$0xff]  ;;  %v473_v20 = vpack.c.bf16 %v100_v13, %v95_v9  ;;  %v105_v21 = vld [vmem:[%s1150_s0 + $0x2d8] sm:$0xff]  ;;  %v66_v23 = vld [vmem:[%s1150_s0 + $0x1a0] sm:$0xff]  ;;  %v475_v28 = vpack.c.bf16 %v99_v18, %v94_v17 }
  0x15   :  { %460 = vmatpush1.bf16.msra.mxu0 %v459_v41  ;;  %v525_v22 = vpack.c.bf16 %v72_v15, %v67_v14  ;;  %v71_v24 = vld [vmem:[%s1150_s0 + $0x1c8] sm:$0xff]  ;;  %v110_v25 = vld [vmem:[%s1150_s0 + $0x300] sm:$0xff]  ;;  %v77_v26 = vld [vmem:[%s1150_s0 + $0x1f8] sm:$0xff] }
  0x16   :  { %462 = vmatprep.subr.bf16.mxu0 %v461_v46  ;;  %v82_v27 = vld [vmem:[%s1150_s0 + $0x220] sm:$0xff]  ;;  %v104_v29 = vld [vmem:[%s1150_s0 + $0x2d0] sm:$0xff]  ;;  %v109_v30 = vld [vmem:[%s1150_s0 + $0x2f8] sm:$0xff]  ;;  %v527_v31 = vpack.c.bf16 %v71_v24, %v66_v23  ;;  %v477_v33 = vpack.c.bf16 %v110_v25, %v105_v21 }
  0x17   :  { %520 = vmatpush1.bf16.msra.mxu1 %v519_v7  ;;  %v843_v32 = vld [vmem:[%s1151_s1 + $0x8] sm:$0xff]  ;;  %v529_v35 = vpack.c.bf16 %v82_v27, %v77_v26  ;;  %v76_v36 = vld [vmem:[%s1150_s0 + $0x1f0] sm:$0xff]  ;;  %v81_v37 = vld [vmem:[%s1150_s0 + $0x218] sm:$0xff]  ;;  %v479_v41 = vpack.c.bf16 %v109_v30, %v104_v29 }
  0x18   :  { %522 = vmatprep.subr.bf16.mxu1 %v521_v10  ;;  %v115_v34 = vld [vmem:[%s1150_s0 + $0x328] sm:$0xff]  ;;  %v120_v38 = vld [vmem:[%s1150_s0 + $0x350] sm:$0xff]  ;;  %238 = vmatprep.mubr.f32.mxu0 %v843_v32  ;;  %v114_v42 = vld [vmem:[%s1150_s0 + $0x320] sm:$0xff]  ;;  %v531_v44 = vpack.c.bf16 %v81_v37, %v76_v36 }
  0x19   :  { %464 = vmatpush1.bf16.msra.mxu0 %v463_v54  ;;  %v87_v39 = vld [vmem:[%s1150_s0 + $0x248] sm:$0xff]  ;;  %v92_v40 = vld [vmem:[%s1150_s0 + $0x270] sm:$0xff]  ;;  %309 = vmatprep.mubr.f32.mxu1 %v843_v32  ;;  %v481_v45 = vpack.c.bf16 %v120_v38, %v115_v34  ;;  %v125_v46 = vld [vmem:[%s1150_s0 + $0x378] sm:$0xff] }
  0x1a   :  { %466 = vmatprep.subr.bf16.mxu0 %v465_v59  ;;  %v119_v43 = vld [vmem:[%s1150_s0 + $0x348] sm:$0xff]  ;;  %v533_v47 = vpack.c.bf16 %v92_v40, %v87_v39  ;;  %v86_v48 = vld [vmem:[%s1150_s0 + $0x240] sm:$0xff]  ;;  %v97_v51 = vld [vmem:[%s1150_s0 + $0x298] sm:$0xff] }
  0x1b   :  { %524 = vmatpush1.bf16.msra.mxu1 %v523_v19  ;;  %v91_v49 = vld [vmem:[%s1150_s0 + $0x268] sm:$0xff]  ;;  %v130_v50 = vld [vmem:[%s1150_s0 + $0x3a0] sm:$0xff]  ;;  %v483_v53 = vpack.c.bf16 %v119_v43, %v114_v42  ;;  %v124_v54 = vld [vmem:[%s1150_s0 + $0x370] sm:$0xff] }
  0x1c   :  { %526 = vmatprep.subr.bf16.mxu1 %v525_v22  ;;  %v102_v52 = vld [vmem:[%s1150_s0 + $0x2c0] sm:$0xff]  ;;  %v129_v55 = vld [vmem:[%s1150_s0 + $0x398] sm:$0xff]  ;;  %v535_v56 = vpack.c.bf16 %v91_v49, %v86_v48  ;;  %v485_v57 = vpack.c.bf16 %v130_v50, %v125_v46  ;;  %v135_v58 = vld [vmem:[%s1150_s0 + $0x3c8] sm:$0xff] }
  0x1d   :  { %468 = vmatpush1.bf16.msra.mxu0 %v467_v4  ;;  %v537_v59 = vpack.c.bf16 %v102_v52, %v97_v51  ;;  %v96_v60 = vld [vmem:[%s1150_s0 + $0x290] sm:$0xff]  ;;  %v101_v61 = vld [vmem:[%s1150_s0 + $0x2b8] sm:$0xff]  ;;  %v107_v63 = vld [vmem:[%s1150_s0 + $0x2e8] sm:$0xff]  ;;  %v487_v1 = vpack.c.bf16 %v129_v55, %v124_v54 }
  0x1e   :  { %470 = vmatprep.subr.bf16.mxu0 %v469_v8  ;;  %v140_v62 = vld [vmem:[%s1150_s0 + $0x3f0] sm:$0xff]  ;;  %v134_v2 = vld [vmem:[%s1150_s0 + $0x3c0] sm:$0xff]  ;;  %v139_v3 = vld [vmem:[%s1150_s0 + $0x3e8] sm:$0xff]  ;;  %v539_v4 = vpack.c.bf16 %v101_v61, %v96_v60 }
  0x1f   :  { %528 = vmatpush1.bf16.msra.mxu1 %v527_v31  ;;  %v112_v0 = vld [vmem:[%s1150_s0 + $0x310] sm:$0xff]  ;;  %v489_v5 = vpack.c.bf16 %v140_v62, %v135_v58  ;;  %v145_v6 = vld [vmem:[%s1150_s0 + $0x418] sm:$0xff]  ;;  %v106_v8 = vld [vmem:[%s1150_s0 + $0x2e0] sm:$0xff]  ;;  %v491_v13 = vpack.c.bf16 %v139_v3, %v134_v2 }
  0x20   :  { %530 = vmatprep.subr.bf16.mxu1 %v529_v35  ;;  %v541_v7 = vpack.c.bf16 %v112_v0, %v107_v63  ;;  %v111_v9 = vld [vmem:[%s1150_s0 + $0x308] sm:$0xff]  ;;  %v150_v10 = vld [vmem:[%s1150_s0 + $0x440] sm:$0xff]  ;;  %v117_v11 = vld [vmem:[%s1150_s0 + $0x338] sm:$0xff] }
  0x21   :  { %472 = vmatpush1.bf16.msra.mxu0 %v471_v16  ;;  %v122_v12 = vld [vmem:[%s1150_s0 + $0x360] sm:$0xff]  ;;  %v144_v14 = vld [vmem:[%s1150_s0 + $0x410] sm:$0xff]  ;;  %v149_v15 = vld [vmem:[%s1150_s0 + $0x438] sm:$0xff]  ;;  %v543_v16 = vpack.c.bf16 %v111_v9, %v106_v8  ;;  %v493_v17 = vpack.c.bf16 %v150_v10, %v145_v6 }
  0x22   :  { %474 = vmatprep.subr.bf16.mxu0 %v473_v20  ;;  %v155_v18 = vld [vmem:[%s1150_s0 + $0x468] sm:$0xff]  ;;  %v545_v19 = vpack.c.bf16 %v122_v12, %v117_v11  ;;  %v116_v20 = vld [vmem:[%s1150_s0 + $0x330] sm:$0xff]  ;;  %v121_v21 = vld [vmem:[%s1150_s0 + $0x358] sm:$0xff]  ;;  %v495_v25 = vpack.c.bf16 %v149_v15, %v144_v14 }
  0x23   :  { %532 = vmatpush1.bf16.msra.mxu1 %v531_v44  ;;  %v160_v22 = vld [vmem:[%s1150_s0 + $0x490] sm:$0xff]  ;;  %v127_v23 = vld [vmem:[%s1150_s0 + $0x388] sm:$0xff]  ;;  %v154_v26 = vld [vmem:[%s1150_s0 + $0x460] sm:$0xff]  ;;  %v547_v29 = vpack.c.bf16 %v121_v21, %v116_v20 }
  0x24   :  { %534 = vmatprep.subr.bf16.mxu1 %v533_v47  ;;  %v132_v24 = vld [vmem:[%s1150_s0 + $0x3b0] sm:$0xff]  ;;  %v159_v27 = vld [vmem:[%s1150_s0 + $0x488] sm:$0xff]  ;;  %v497_v30 = vpack.c.bf16 %v160_v22, %v155_v18  ;;  %v170_v31 = vld [vmem:[%s1150_s0 + $0x4e0] sm:$0xff] }
  0x25   :  { %476 = vmatpush1.bf16.msra.mxu0 %v475_v28  ;;  %v165_v28 = vld [vmem:[%s1150_s0 + $0x4b8] sm:$0xff]  ;;  %v126_v34 = vld [vmem:[%s1150_s0 + $0x380] sm:$0xff]  ;;  %v131_v35 = vld [vmem:[%s1150_s0 + $0x3a8] sm:$0xff] }
  0x26   :  { %478 = vmatprep.subr.bf16.mxu0 %v477_v33  ;;  %v549_v33 = vpack.c.bf16 %v132_v24, %v127_v23  ;;  %v137_v36 = vld [vmem:[%s1150_s0 + $0x3d8] sm:$0xff]  ;;  %v142_v37 = vld [vmem:[%s1150_s0 + $0x400] sm:$0xff] }
  0x27   :  { %536 = vmatpush1.bf16.msra.mxu1 %v535_v56 }
  0x28   :  { %538 = vmatprep.subr.bf16.mxu1 %v537_v59 }
  0x29   :  { %480 = vmatpush1.bf16.msra.mxu0 %v479_v41 }
  0x2a   :  { %482 = vmatprep.subr.bf16.mxu0 %v481_v45 }
  0x2b   :  { %540 = vmatpush1.bf16.msra.mxu1 %v539_v4 }
  0x2c   :  { %542 = vmatprep.subr.bf16.mxu1 %v541_v7 }
  0x2d   :  { %484 = vmatpush1.bf16.msra.mxu0 %v483_v53 }
  0x2e   :  { %486 = vmatprep.subr.bf16.mxu0 %v485_v57 }
  0x2f   :  { %544 = vmatpush1.bf16.msra.mxu1 %v543_v16 }
  0x30   :  { %546 = vmatprep.subr.bf16.mxu1 %v545_v19 }
  0x31   :  { %488 = vmatpush1.bf16.msra.mxu0 %v487_v1 }
  0x32   :  { %490 = vmatprep.subr.bf16.mxu0 %v489_v5 }
  0x35   :  { %492 = vmatpush1.bf16.msra.mxu0 %v491_v13 }
  0x36   :  { %494 = vmatprep.subr.bf16.mxu0 %v493_v17 }
  0x37   :  { %7 = vsyncpa [#allocation3], 0  ;;  %v499_v38 = vpack.c.bf16 %v159_v27, %v154_v26  ;;  %v164_v39 = vld [vmem:[%s1150_s0 + $0x4b0] sm:$0xff]  ;;  %v169_v40 = vld [vmem:[%s1150_s0 + $0x4d8] sm:$0xff]  ;;  %548 = vmatpush1.bf16.msra.mxu1 %v547_v29  ;;  %v551_v41 = vpack.c.bf16 %v131_v35, %v126_v34  ;;  %v501_v42 = vpack.c.bf16 %v170_v31, %v165_v28  ;;  %v553_v44 = vpack.c.bf16 %v142_v37, %v137_v36 }
  0x38   :  { %v98_v43 = vld [vmem:[%s1150_s0 + $0x2a0] sm:$0xff]  ;;  %550 = vmatprep.subr.bf16.mxu1 %v549_v33  ;;  %v136_v45 = vld [vmem:[%s1150_s0 + $0x3d0] sm:$0xff]  ;;  %v141_v46 = vld [vmem:[%s1150_s0 + $0x3f8] sm:$0xff]  ;;  %v503_v50 = vpack.c.bf16 %v169_v40, %v164_v39  ;;  %vm390_vm0 = vcmask 523264  }
  0x39   :  { %496 = vmatpush1.bf16.msra.mxu0 %v495_v25  ;;  %v103_v47 = vld [vmem:[%s1150_s0 + $0x2c8] sm:$0xff]  ;;  %v152_v49 = vld [vmem:[%s1150_s0 + $0x450] sm:$0xff]  ;;  %v18_v51 = vld [vmem:[%s1150_s0 + $0x20] sm:$0xff]  ;;  %v555_v53 = vpack.c.bf16 %v141_v46, %v136_v45 }
  0x3a   :  { %498 = vmatprep.subr.bf16.mxu0 %v497_v30  ;;  %v147_v48 = vld [vmem:[%s1150_s0 + $0x428] sm:$0xff]  ;;  %v569_v54 = vpack.c.bf16 %v103_v47, %v98_v43  ;;  %v108_v55 = vld [vmem:[%s1150_s0 + $0x2f0] sm:$0xff]  ;;  %v146_v57 = vld [vmem:[%s1150_s0 + $0x420] sm:$0xff] }
  0x3b   :  { %v23_v52 = vld [vmem:[%s1150_s0 + $0x48] sm:$0xff]  ;;  %552 = vmatpush1.bf16.msra.mxu1 %v551_v41  ;;  %v557_v56 = vpack.c.bf16 %v152_v49, %v147_v48  ;;  %v113_v59 = vld [vmem:[%s1150_s0 + $0x318] sm:$0xff]  ;;  %v162_v61 = vld [vmem:[%s1150_s0 + $0x4a0] sm:$0xff] }
  0x3c   :  { %554 = vmatprep.subr.bf16.mxu1 %v553_v44  ;;  %v151_v58 = vld [vmem:[%s1150_s0 + $0x448] sm:$0xff]  ;;  %v157_v60 = vld [vmem:[%s1150_s0 + $0x478] sm:$0xff]  ;;  %v1036_v62 = vld [vmem:[%s1151_s1] sm:$0xff]  ;;  %v571_v63 = vpack.c.bf16 %v23_v52, %v18_v51  ;;  %v573_v3 = vpack.c.bf16 %v113_v59, %v108_v55  ;;  %s626_s1 = smov [#allocation2]  }
  0x3d   :  { %500 = vmatpush1.bf16.msra.mxu0 %v499_v38  ;;  %v28_v0 = vld [vmem:[%s1150_s0 + $0x70] sm:$0xff]  ;;  %v33_v1 = vld [vmem:[%s1150_s0 + $0x98] sm:$0xff]  ;;  %v559_v2 = vpack.c.bf16 %v151_v58, %v146_v57  ;;  %v118_v4 = vld [vmem:[%s1150_s0 + $0x340] sm:$0xff]  ;;  %v561_v5 = vpack.c.bf16 %v162_v61, %v157_v60  ;;  %s398_s23 = sshll.u32 %s626_s1, 4  ;;  %s399_s23 = int_to_ptr.vmem [resolvable:$true] %s398_s23 }
  0x3e   :  { %502 = vmatprep.subr.bf16.mxu0 %v501_v42  ;;  %v156_v6 = vld [vmem:[%s1150_s0 + $0x470] sm:$0xff]  ;;  %v161_v7 = vld [vmem:[%s1150_s0 + $0x498] sm:$0xff]  ;;  %v123_v8 = vld [vmem:[%s1150_s0 + $0x368] sm:$0xff]  ;;  %v575_v11 = vpack.c.bf16 %v33_v1, %v28_v0  ;;  %p607_p1 = scmp.lt.s32.totalorder %s399_s23, %s399_s23 }
  0x3f   :  { %556 = vmatpush1.bf16.msra.mxu1 %v555_v53  ;;  %v167_v9 = vld [vmem:[%s1150_s0 + $0x4c8] sm:$0xff]  ;;  %v172_v10 = vld [vmem:[%s1150_s0 + $0x4f0] sm:$0xff]  ;;  %v38_v12 = vld [vmem:[%s1150_s0 + $0xc0] sm:$0xff]  ;;  %v563_v13 = vpack.c.bf16 %v161_v7, %v156_v6  ;;  %v577_v14 = vpack.c.bf16 %v123_v8, %v118_v4 }
  0x40   :  { %558 = vmatprep.subr.bf16.mxu1 %v557_v56  ;;  %v43_v15 = vld [vmem:[%s1150_s0 + $0xe8] sm:$0xff]  ;;  %v565_v16 = vpack.c.bf16 %v172_v10, %v167_v9  ;;  %v166_v17 = vld [vmem:[%s1150_s0 + $0x4c0] sm:$0xff]  ;;  %v128_v19 = vld [vmem:[%s1150_s0 + $0x390] sm:$0xff] }
  0x41   :  { %504 = vmatpush1.bf16.msra.mxu0 %v503_v50  ;;  %v171_v18 = vld [vmem:[%s1150_s0 + $0x4e8] sm:$0xff]  ;;  %v133_v20 = vld [vmem:[%s1150_s0 + $0x3b8] sm:$0xff]  ;;  %v579_v21 = vpack.c.bf16 %v43_v15, %v38_v12  ;;  %v48_v24 = vld [vmem:[%s1150_s0 + $0x110] sm:$0xff] }
  0x42   :  { %570 = vmatprep.subr.bf16.mxu0 %v569_v54  ;;  %v567_v22 = vpack.c.bf16 %v171_v18, %v166_v17  ;;  %v581_v23 = vpack.c.bf16 %v133_v20, %v128_v19  ;;  %v53_v25 = vld [vmem:[%s1150_s0 + $0x138] sm:$0xff]  ;;  %v138_v26 = vld [vmem:[%s1150_s0 + $0x3e0] sm:$0xff]  ;;  %v63_v30 = vld [vmem:[%s1150_s0 + $0x188] sm:$0xff] }
  0x43   :  { %560 = vmatpush1.bf16.msra.mxu1 %v559_v2  ;;  %v583_v27 = vpack.c.bf16 %v53_v25, %v48_v24  ;;  %v58_v29 = vld [vmem:[%s1150_s0 + $0x160] sm:$0xff]  ;;  %v148_v31 = vld [vmem:[%s1150_s0 + $0x430] sm:$0xff]  ;;  %v153_v33 = vld [vmem:[%s1150_s0 + $0x458] sm:$0xff] }
  0x44   :  { %239 = vmatmul.mubr.f32.vlgmr.msra.gmra.mrb[0].mxu0 %v1036_v62  ;;  %562 = vmatprep.subr.bf16.mxu1 %v561_v5  ;;  %v587_v34 = vpack.c.bf16 %v63_v30, %v58_v29  ;;  %v589_v35 = vpack.c.bf16 %v153_v33, %v148_v31  ;;  %v68_v36 = vld [vmem:[%s1150_s0 + $0x1b0] sm:$0xff]  ;;  %v73_v37 = vld [vmem:[%s1150_s0 + $0x1d8] sm:$0xff]  ;;  %v158_v38 = vld [vmem:[%s1150_s0 + $0x480] sm:$0xff] }
  0x45   :  { %572 = vmatpush3.bf16.msra.mxu0 %v571_v63  ;;  %380 = vmatprep.mubr.f32.mxu0 %v843_v32  ;;  %v143_v32 = vld [vmem:[%s1150_s0 + $0x408] sm:$0xff]  ;;  %v591_v40 = vpack.c.bf16 %v73_v37, %v68_v36  ;;  %v78_v42 = vld [vmem:[%s1150_s0 + $0x200] sm:$0xff]  ;;  %v168_v44 = vld [vmem:[%s1150_s0 + $0x4d0] sm:$0xff] }
  0x46   :  { %574 = vmatprep.subr.bf16.mxu0 %v573_v3  ;;  %v585_v28 = vpack.c.bf16 %v143_v32, %v138_v26  ;;  %v163_v39 = vld [vmem:[%s1150_s0 + $0x4a8] sm:$0xff]  ;;  %v173_v45 = vld [vmem:[%s1150_s0 + $0x4f8] sm:$0xff]  ;;  %v88_v48 = vld [vmem:[%s1150_s0 + $0x250] sm:$0xff] }
  0x47   :  { %564 = vmatpush1.bf16.msra.mxu1 %v563_v13  ;;  %v593_v41 = vpack.c.bf16 %v163_v39, %v158_v38  ;;  %v83_v43 = vld [vmem:[%s1150_s0 + $0x228] sm:$0xff]  ;;  %v597_v47 = vpack.c.bf16 %v173_v45, %v168_v44  ;;  %v93_v49 = vld [vmem:[%s1150_s0 + $0x278] sm:$0xff]  ;;  %s602_s0 = scalar_lea.vmem %s399_s23, 640 }
  0x48   :  { %566 = vmatprep.subr.bf16.mxu1 %v565_v16  ;;  %v595_v46 = vpack.c.bf16 %v83_v43, %v78_v42  ;;  %v599_v50 = vpack.c.bf16 %v93_v49, %v88_v48  ;;  %p603_p0 = scmp.ne.s32.totalorder %s399_s23, %s602_s0  ;;  %p608_p2 = scmp.lt.s32.totalorder %s602_s0, %s602_s0 }
  0x49   :  { %576 = vmatpush3.bf16.msra.mxu0 %v575_v11 }
  0x4a   :  { %578 = vmatprep.subr.bf16.mxu0 %v577_v14  ;;  %p609_p3 = por %p608_p2, %p607_p1 }
  0x4b   :  { %568 = vmatpush1.bf16.msra.mxu1 %v567_v22 }
  0x4c   :  { %p610_p4 = pnand %p609_p3, %p603_p0 }
  0x4d   :  { %580 = vmatpush3.bf16.msra.mxu0 %v579_v21 }
  0x4e   :  { %582 = vmatprep.subr.bf16.mxu0 %v581_v23  ;;  %310 = vmatmul.mubr.f32.vlgmr.msra.gmra.mrb[0].mxu1 %v1036_v62 }
  0x51   :  { %584 = vmatpush3.bf16.msra.mxu0 %v583_v27 }
  0x52   :  { %586 = vmatprep.subr.bf16.mxu0 %v585_v28 }
  0x55   :  { %588 = vmatpush3.bf16.msra.mxu0 %v587_v34 }
  0x56   :  { %590 = vmatprep.subr.bf16.mxu0 %v589_v35 }
  0x59   :  { %592 = vmatpush3.bf16.msra.mxu0 %v591_v40 }
  0x5a   :  { %594 = vmatprep.subr.bf16.mxu0 %v593_v41 }
  0x5d   :  { %596 = vmatpush3.bf16.msra.mxu0 %v595_v46 }
  0x5e   :  { %598 = vmatprep.subr.bf16.mxu0 %v597_v47 }
  0x61   :  { %600 = vmatpush3.bf16.msra.mxu0 %v599_v50 }
  0x64   :  { %381 = vmatmul.mubr.f32.vlgmr.msra.gmra.mrb[2].mxu0 %v1036_v62 }
 0x117   :  { %v240_v51 = vpop.f32.mrb[0].mxu0 }
 0x118   :  { %386 = vst [vmem:[#allocation2] sm:$0xff] %v240_v51  ;;  %v242_v52 = vpop.f32.mrb[1].mxu0 }
 0x119   :  { %387 = vst [vmem:[#allocation2 + $0x8] sm:$0xff] %v242_v52 }
 0x121   :  { %v311_v53 = vpop.f32.mrb[0].mxu1 }
 0x122   :  { %388 = vst [vmem:[#allocation2 + $0x10] sm:$0xff] %v311_v53  ;;  %v313_v54 = vpop.f32.mrb[1].mxu1 }
 0x123   :  { %389 = vst [vmem:[#allocation2 + $0x18] sm:$0xff] %v313_v54 }
 0x137   :  { %v438_v55 = vpop.f32.mrb[2].mxu0 }
 0x138   :  { %v439_v56 = vpop.f32.mrb[3].mxu0 }
 0x139   :  { %v440_v57 = vadd.f32 %v439_v56, %v438_v55 }
 0x13b   :  { %391 = vst.msk [vmem:[#allocation2 + $0x20] sm:$0xff] %vm390_vm0, %v440_v57 }
 0x13c   :  { %613 = shalt.err (!%p610_p4)
}
 0x13d   :  { %s614_s26 = scalar_lea.hbm %s1152_s2, 640 }
 0x13e   :  { %p615_p5 = scmp.ne.s32.totalorder %s1152_s2, %s614_s26  ;;  %p618_p6 = scmp.lt.u32.totalorder %s614_s26, %s1152_s2 }
 0x140   :  { %p620_p7 = pnand %p618_p6, %p615_p5 }
 0x142   :  { %623 = shalt.err (!%p620_p7)
}
 0x143   :  { %401 = dma.vmem_to_hbm [thread:$0]  %s399_s23, 640, %s1152_s2, [#allocation3]  }
 0x144   :  { %624 = dma.done.wait [#allocation3], 640  }
 0x145   :  { %625 = vsyncadd [#allocation3], 4294966656 }
 0x146   :  { %405 = vsyncpa [#allocation3], 1 }

</bundles_post_ra>
